<compile_context>
chip_gen: v6e
topology: v6e:2x2x1
jax: 0.10.0
libtpu: 0.0.40
codegen_flags: <defaults>
</compile_context>

<pallas_src>
import jax
import jax.numpy as jnp
from jax.experimental import pallas as pl
from jax.experimental.pallas import tpu as pltpu


def actor_kernel(h_ref, dw_ref, db_ref, o_ref):
    """One batch tile of the 2-class policy head.

    h_ref:  (TB, H) activation tile (streamed over the batch grid).
    dw_ref: (1, H)  folded weight row  w[:, 1] - w[:, 0]  (f32, resident).
    db_ref: (1,)    folded bias scalar b[1] - b[0]        (f32, SMEM).
    o_ref:  (TB, 2) class probabilities (f32).
    """
    h = h_ref[...].astype(jnp.float32)          # f32 accumulation even for bf16 inputs
    # VPU broadcast-multiply + XLU lane reduction over H (no degenerate N=1 MXU matmul).
    d = jnp.sum(h * dw_ref[...], axis=-1, keepdims=True) + db_ref[0]      # (TB, 1)
    # softmax over the 2 classes == [sigmoid(-d), sigmoid(d)].
    # sigmoid(-d) (not 1 - sigmoid(d)) avoids catastrophic cancellation for d >> 0.
    # (pl.reciprocal(..., approx=True) would push the divide onto the EUP slot, but
    #  exact division keeps the result within 1e-5 of the jnp reference.)
    p1 = 1.0 / (1.0 + jnp.exp(-d))                                        # (TB, 1)
    p0 = 1.0 / (1.0 + jnp.exp(d))                                         # (TB, 1)
    col = jax.lax.broadcasted_iota(jnp.int32, o_ref.shape, 1)             # class 0/1
    o_ref[...] = jnp.where(col == 1, p1, p0).astype(o_ref.dtype)


def _round_up(x: int, m: int) -> int:
    return ((x + m - 1) // m) * m


def _vmem_capacity_bytes() -> int:
    """Physical VMEM of the attached TPU; v7x-safe fallback when unknown."""
    try:
        info = pltpu.get_tpu_info()
        cap = getattr(info, "vmem_capacity_bytes", None)
        if cap:
            return int(cap)
    except Exception:
        pass
    return 64 * 1024 * 1024  # v7x per-TensorCore VMEM (the smallest current gen)


def _batch_tile(batch: int, hidden_size: int, itemsize: int, budget: int) -> int:
    """Largest sublane-aligned batch tile whose resident VMEM working set fits
    `budget`, while keeping >= 2 grid steps so both v7x TensorCores get work."""
    align = max(8, 32 // itemsize)   # sublanes per packed word: f32->8, bf16->16, int8->32
    if batch <= align:
        return batch                 # single block == full array dims (always legal)
    # Resident VMEM buffers:
    #   activations: 2 x (TB, H) double-buffered input tiles
    #   output     : 2 x (TB, 2) -> lane-padded to (TB, 128), f32
    #   weight row : (1, H) -> sublane-padded to (8, H), f32 (budgeted double-buffered)
    weight_bytes = 2 * 8 * hidden_size * 4
    per_row = 2 * hidden_size * itemsize + 2 * 128 * 4
    avail = max(budget - weight_bytes, per_row * align)
    tb = avail // per_row
    tb = min(tb, _round_up(pl.cdiv(batch, 2), align))   # floor grid at >= 2 steps (v7x)
    tb = max(align, (tb // align) * align)              # dtype-aware sublane alignment
    return min(tb, batch)


def decentralized_actor_forward(hidden, w, b, *, use_pallas=None):
    """softmax(hidden @ w + b, axis=1) for the 2-class policy head.

    hidden: (B, H) float32/bfloat16; w: (H, 2); b: (2,)-like. Returns (B, 2) float32.
    """
    B, H = hidden.shape
    w = w.astype(jnp.float32)
    b = jnp.reshape(b, (2,)).astype(jnp.float32)

    if use_pallas is None:
        # Tiny heads: fixed dispatch + ~0.35 us/step dwarfs the math; use the fused
        # jnp expression (or fold this sigmoid epilogue into the producer kernel).
        use_pallas = B * H >= (1 << 16)
    if not use_pallas:
        return jax.nn.softmax(hidden.astype(jnp.float32) @ w + b[None, :], axis=1)

    # Fold the 2-class head into one f32 row + one scalar (tiny, done once outside).
    # Kept f32 so the weight *difference* is not rounded to the activation dtype.
    dw = (w[:, 1] - w[:, 0]).reshape(1, H)
    db = (b[1] - b[0]).reshape(1)

    itemsize = jnp.dtype(hidden.dtype).itemsize
    vmem_cap = _vmem_capacity_bytes()
    # v5e/v6e (128 MiB physical) -> 96 MiB scoped limit; v7x (64 MiB) -> 48 MiB.
    vmem_limit = int(min(vmem_cap * 3 // 4, 96 * 1024 * 1024))
    budget = vmem_limit - 4 * 1024 * 1024       # headroom for compiler-internal scratch

    TB = _batch_tile(B, H, itemsize, budget)
    grid = (pl.cdiv(B, TB),)

    cost = pl.CostEstimate(
        flops=2 * B * H + 6 * B,                 # matvec + epilogue
        transcendentals=2 * B,                   # two exp per row
        bytes_accessed=B * H * itemsize + H * 4 + 4 + B * 2 * 4,
    )

    return pl.pallas_call(
        actor_kernel,
        out_shape=jax.ShapeDtypeStruct((B, 2), jnp.float32),
        grid=grid,
        in_specs=[
            pl.BlockSpec((TB, H), lambda i: (i, 0)),           # stream activations
            pl.BlockSpec((1, H), lambda i: (0, 0)),            # resident weight row
            pl.BlockSpec(memory_space=pltpu.MemorySpace.SMEM),  # scalar bias diff
        ],
        out_specs=pl.BlockSpec((TB, 2), lambda i: (i, 0)),
        compiler_params=pltpu.CompilerParams(
            dimension_semantics=("parallel",),                  # batch across TCs (v7x)
            vmem_limit_bytes=vmem_limit,
        ),
        cost_estimate=cost,
    )(hidden, dw, db)


if __name__ == "__main__":
    key = jax.random.PRNGKey(0)
    k_h, k_w, k_b = jax.random.split(key, 3)

    batch = 8
    hidden_size = 32

    # nn.Linear(hidden_size, 2) parameters (PyTorch stores weight as (2, H);
    # we keep the transposed (H, 2) layout).
    bound = 1.0 / (hidden_size ** 0.5)
    w = jax.random.uniform(k_w, (hidden_size, 2), jnp.float32, -bound, bound)
    b = jax.random.uniform(k_b, (2,), jnp.float32, -bound, bound)
    hidden = jax.random.normal(k_h, (batch, hidden_size), jnp.float32)

    # Force the Pallas path at this tiny demo shape (the auto heuristic would take
    # the fused-jnp fast path for B*H this small).
    out = jax.block_until_ready(
        decentralized_actor_forward(hidden, w, b, use_pallas=True))

    # Reference: F.softmax(policy(hidden), dim=1)
    ref = jax.nn.softmax(hidden @ w + b[None, :], axis=1)
    assert out.shape == (batch, 2)
    assert jnp.allclose(out, ref, atol=1e-5, rtol=1e-5)
    assert jnp.allclose(jnp.sum(out, axis=1), 1.0, atol=1e-5)

    print("KERNEL_OK")
</pallas_src>

<mosaic_0001>
module attributes {stable_mosaic.version = 11 : i64} {
  func.func @actor_kernel(%arg0: i32, %arg1: memref<8x32xf32, #tpu.memory_space<vmem>>, %arg2: memref<1x32xf32, #tpu.memory_space<vmem>>, %arg3: memref<1xf32, #tpu.memory_space<smem>>, %arg4: memref<8x2xf32, #tpu.memory_space<vmem>>) attributes {dimension_semantics = [#tpu.dimension_semantics<parallel>], iteration_bounds = array<i64: 1>, scalar_prefetch = 0 : i64, scratch_operands = 0 : i64, tpu.core_type = #tpu.core_type<tc>, window_params = [{transform_indices = @transform_0, window_bounds = array<i64: 8, 32>}, {pipeline_mode = #tpu.pipeline_mode<synchronous>, transform_indices = @transform_1, window_bounds = array<i64: 1, 32>}, {transform_indices = @transform_2, window_bounds = array<i64: 1>}, {transform_indices = @transform_3, window_bounds = array<i64: 8, 2>}]} {
    %c0 = arith.constant 0 : index
    %c0_0 = arith.constant 0 : index
    %0 = vector.load %arg1[%c0, %c0_0] : memref<8x32xf32, #tpu.memory_space<vmem>>, vector<8x32xf32>
    %c0_1 = arith.constant 0 : index
    %c0_2 = arith.constant 0 : index
    %1 = vector.load %arg2[%c0_1, %c0_2] : memref<1x32xf32, #tpu.memory_space<vmem>>, vector<1x32xf32>
    %2 = vector.broadcast %1 : vector<1x32xf32> to vector<8x32xf32>
    %3 = arith.mulf %0, %2 : vector<8x32xf32>
    %cst = arith.constant dense<0.000000e+00> : vector<8xf32>
    %4 = vector.multi_reduction <add>, %3, %cst [1] : vector<8x32xf32> to vector<8xf32>
    %5 = vector.shape_cast %4 : vector<8xf32> to vector<8x1xf32>
    %c0_3 = arith.constant 0 : index
    %6 = memref.load %arg3[%c0_3] : memref<1xf32, #tpu.memory_space<smem>>
    %7 = vector.broadcast %6 : f32 to vector<8x1xf32>
    %8 = arith.addf %5, %7 : vector<8x1xf32>
    %cst_4 = arith.constant 0.000000e+00 : f32
    %9 = vector.broadcast %cst_4 : f32 to vector<8x1xf32>
    %10 = arith.subf %9, %8 : vector<8x1xf32>
    %11 = math.exp %10 : vector<8x1xf32>
    %cst_5 = arith.constant 1.000000e+00 : f32
    %12 = vector.broadcast %cst_5 : f32 to vector<8x1xf32>
    %13 = arith.addf %12, %11 : vector<8x1xf32>
    %cst_6 = arith.constant 1.000000e+00 : f32
    %14 = vector.broadcast %cst_6 : f32 to vector<8x1xf32>
    %15 = arith.divf %14, %13 : vector<8x1xf32>
    %16 = math.exp %8 : vector<8x1xf32>
    %cst_7 = arith.constant 1.000000e+00 : f32
    %17 = vector.broadcast %cst_7 : f32 to vector<8x1xf32>
    %18 = arith.addf %17, %16 : vector<8x1xf32>
    %cst_8 = arith.constant 1.000000e+00 : f32
    %19 = vector.broadcast %cst_8 : f32 to vector<8x1xf32>
    %20 = arith.divf %19, %18 : vector<8x1xf32>
    %21 = tpu.iota {dimensions = array<i32: 1>} : vector<8x2xi32>
    %c1_i32 = arith.constant 1 : i32
    %22 = vector.broadcast %c1_i32 : i32 to vector<8x2xi32>
    %23 = arith.cmpi eq, %21, %22 : vector<8x2xi32>
    %24 = vector.shape_cast %15 : vector<8x1xf32> to vector<8x1xf32>
    %25 = vector.broadcast %24 : vector<8x1xf32> to vector<8x2xf32>
    %26 = vector.shape_cast %20 : vector<8x1xf32> to vector<8x1xf32>
    %27 = vector.broadcast %26 : vector<8x1xf32> to vector<8x2xf32>
    %28 = arith.select %23, %25, %27 : vector<8x2xi1>, vector<8x2xf32>
    %c0_9 = arith.constant 0 : index
    %c0_10 = arith.constant 0 : index
    %29 = vector.load %arg4[%c0_9, %c0_10] : memref<8x2xf32, #tpu.memory_space<vmem>>, vector<8x2xf32>
    tpu.vector_store %arg4[%c0_9, %c0_10], %28 {strides = array<i32>} : memref<8x2xf32, #tpu.memory_space<vmem>>, vector<8x2xf32>,
    return
  }
  func.func @transform_0(%arg0: i32) -> (i32, i32) {
    %c0_i32 = arith.constant 0 : i32
    %c0_i32_0 = arith.constant 0 : i32
    return %arg0, %c0_i32 : i32, i32
  }
  func.func @transform_1(%arg0: i32) -> (i32, i32) {
    %c0_i32 = arith.constant 0 : i32
    %c0_i32_0 = arith.constant 0 : i32
    %c0_i32_1 = arith.constant 0 : i32
    return %c0_i32, %c0_i32_0 : i32, i32
  }
  func.func @transform_2(%arg0: i32) -> i32 {
    %c0_i32 = arith.constant 0 : i32
    %c0_i32_0 = arith.constant 0 : i32
    return %c0_i32 : i32
  }
  func.func @transform_3(%arg0: i32) -> (i32, i32) {
    %c0_i32 = arith.constant 0 : i32
    %c0_i32_0 = arith.constant 0 : i32
    return %arg0, %c0_i32 : i32, i32
  }
}

</mosaic_0001>

<bundles_post_ra>
// kernel: tpu_custom_call.1
= control target key start
LH: loop header
LB: loop body
LE: loop exit
PB: predicated region body
PF: predicated region fallthrough
CT: control target
= control target key end

     0   :  { %9 = vsyncpa [#allocation4], 0  ;;  %s97_s12 = smov [#allocation3]   ;;  %s130_s0 = inlined_call_operand.hbm [shape: f32[8,32], index: 0, kind: input, shape index: {}]   ;;  %s131_s1 = inlined_call_operand.vmem [shape: f32[1,32], index: 1, kind: input, shape index: {}]   ;;  %s132_s2 = inlined_call_operand.<no memory space> [shape: f32[1], index: 2, kind: input, shape index: {}]   ;;  %s133_s3 = inlined_call_operand.vmem [shape: f32[8,2], index: 3, kind: output, shape index: {}]  }
   0x1   :  { %s16_s13 = sshll.u32 %s97_s12, 4  ;;  %s17_s13 = int_to_ptr.vmem [resolvable:$true] %s16_s13 }
   0x2   :  { %s83_s14 = scalar_lea.vmem %s17_s13, 128  ;;  %p88_p1 = scmp.lt.s32.totalorder %s17_s13, %s17_s13 }
   0x3   :  { %p84_p0 = scmp.ne.s32.totalorder %s17_s13, %s83_s14  ;;  %p89_p2 = scmp.lt.s32.totalorder %s83_s14, %s83_s14 }
   0x5   :  { %p90_p3 = por %p89_p2, %p88_p1 }
   0x7   :  { %p91_p4 = pnand %p90_p3, %p84_p0 }
   0x9   :  { %94 = shalt.err (!%p91_p4)
}
   0xa   :  { %19 = dma.hbm_to_vmem [thread:$0]  %s130_s0, 128, %s17_s13, [#allocation4]  }
   0xb   :  { %95 = dma.done.wait [#allocation4], 128  }
   0xc   :  { %96 = vsyncadd [#allocation4], 4294967168  ;;  %v27_v0 = vld [vmem:[#allocation3] sm:$0xff]  ;;  %vm36_vm0 = vcmask 261120   ;;  %v41_v4 = vstv %s132_s2  ;;  %v54_v14 = vlaneseq  ;;  %vm58_vm2 = vcmask 15360  }
   0xd   :  { %v65_v1 = vld [vmem:[%s131_s1] ss:$0 sm:$0xff] }
   0xe   :  { %v35_v2 = vmul.f32 %v65_v1, %v27_v0  ;;  %v55_v15 = vand.u32 127, %v54_v14 }
  0x10   :  { %v37_v3 = vsel %vm36_vm0, %v35_v2, 0.0  ;;  %vm56_vm1 = vcmp.eq.s32.totalorder %v55_v15, 1 }
  0x11   :  { %38 = vadd.xlane.f32.xlu0 %v37_v3 }
  0x9a   :  { %v39_v5 = vpop.xlane.xlu0 %38 }
  0x9b   :  { %v42_v6 = vadd.f32 %v41_v4, %v39_v5 }
  0x9d   :  { %v43_v7 = vsub.f32 0.0, %v42_v6  ;;  %v49_v8 = vmul.f32 1.442695, %v42_v6 }
  0x9f   :  { %v44_v9 = vmul.f32 1.442695, %v43_v7  ;;  %67 = vpow2.f32 %v49_v8 }
  0xa1   :  { %69 = vpow2.f32 %v44_v9 }
  0xac   :  { %v68_v10 = vpop.eup %67 }
  0xad   :  { %v51_v11 = vadd.f32 1.0, %v68_v10 }
  0xae   :  { %v70_v12 = vpop.eup %69 }
  0xaf   :  { %v46_v13 = vadd.f32 1.0, %v70_v12  ;;  %71 = vrcp.f32 %v51_v11 }
  0xb1   :  { %73 = vrcp.f32 %v46_v13 }
  0xbc   :  { %v72_v16 = vpop.eup %71 }
  0xbe   :  { %v74_v17 = vpop.eup %73 }
  0xbf   :  { %v57_v18 = vsel %vm56_vm1, %v74_v17, %v72_v16 }
  0xc0   :  { %59 = vst.msk [vmem:[%s133_s3] sm:$0xff] %vm58_vm2, %v57_v18 }
  0xc1   :  { %64 = vsyncpa [#allocation4], 1 }

</bundles_post_ra>
